<compile_context>
chip_gen: v7x
topology: tpu7x:2x2x1
jax: 0.10.0
libtpu: 0.0.40
codegen_flags: <defaults>
</compile_context>

<pallas_src>
import functools

import jax
import jax.numpy as jnp
import numpy as np
from jax.experimental import pallas as pl
from jax.experimental.pallas import tpu as pltpu


def _round_up(x, m):
    return ((x + m - 1) // m) * m


def _oa_sums_kernel(pred_ref, tgt_ref, a_ref, b_ref, s_ref, *, n_valid):
    """One (T, BN) strip of samples -> accumulate per-task partial sums.

    a_ref += sum_i (1-y)*x + softplus(-x)   (pos_weight-independent part)
    b_ref += sum_i  y * softplus(-x)        (scaled by (pw - 1) in the wrapper)
    s_ref += sum_i  y                       (label count, for batch_weight)
    """
    nb = pl.program_id(0)

    @pl.when(nb == 0)
    def _init():
        a_ref[...] = jnp.zeros_like(a_ref)
        b_ref[...] = jnp.zeros_like(b_ref)
        s_ref[...] = jnp.zeros_like(s_ref)

    x = pred_ref[...].astype(jnp.float32)     # (T, BN) logits, samples on lanes
    y = tgt_ref[...].astype(jnp.float32)      # (T, BN) binary labels

    # Mask lanes past the true batch size (wrapper zero-pads N up to BN mult.).
    bn = x.shape[1]
    col = jax.lax.broadcasted_iota(jnp.int32, x.shape, 1) + nb * bn
    valid = (col < n_valid).astype(jnp.float32)
    y = y * valid

    # Numerically stable softplus(-x) = log(1 + exp(-x)).
    sp = jnp.maximum(-x, 0.0) + jnp.log(1.0 + jnp.exp(-jnp.abs(x)))

    base = ((1.0 - y) * x + sp) * valid       # (T, BN)
    posb = y * sp                             # already masked through y

    # keepdims sums broadcast across all 128 lanes -> lane-dense stores.
    a_ref[...] += jnp.sum(base, axis=1, keepdims=True)
    b_ref[...] += jnp.sum(posb, axis=1, keepdims=True)
    s_ref[...] += jnp.sum(y, axis=1, keepdims=True)


def oa_loss(pred, target, pos_weight, *, batch_weight=False, block_n=1024):
    """Pallas forward of OA_loss.

    pred:       (T, N) per-task logits   (output[t].view(-1) in the module)
    target:     (N, T) binary labels     (target[:, t] in the module)
    pos_weight: (T,)   cfg.pos_weight    (used when batch_weight=False)
    """
    T, N = pred.shape
    assert target.shape == (N, T)

    bn = min(block_n, _round_up(N, 128))
    n_pad = _round_up(N, bn)

    tgt_t = jnp.swapaxes(target, 0, 1)        # (T, N): samples on lanes (layout plumbing)
    if n_pad != N:
        pred = jnp.pad(pred, ((0, 0), (0, n_pad - N)))
        tgt_t = jnp.pad(tgt_t, ((0, 0), (0, n_pad - N)))

    kernel = functools.partial(_oa_sums_kernel, n_valid=N)
    out_struct = jax.ShapeDtypeStruct((T, 128), jnp.float32)
    acc_spec = pl.BlockSpec((T, 128), lambda i: (0, 0))

    a, b, s = pl.pallas_call(
        kernel,
        out_shape=(out_struct, out_struct, out_struct),
        grid=(n_pad // bn,),
        in_specs=[
            pl.BlockSpec((T, bn), lambda i: (0, i)),
            pl.BlockSpec((T, bn), lambda i: (0, i)),
        ],
        out_specs=(acc_spec, acc_spec, acc_spec),
        compiler_params=pltpu.CompilerParams(
            dimension_semantics=("arbitrary",)),   # sample-block reduction axis
    )(pred, tgt_t)

    A = a[:, 0]                                # (T,) per-task partial sums
    B = b[:, 0]
    S = s[:, 0]
    n = float(N)

    # O(T) epilogue (13 scalars): pos_weight / batch_weight combination.
    if batch_weight:
        pw = (n - S) / jnp.where(S > 0, S, 1.0)
        per_task = jnp.where(S > 0, (A + (pw - 1.0) * B) / n, 0.0)
    else:
        pw = jnp.asarray(pos_weight, jnp.float32)
        per_task = (A + (pw - 1.0) * B) / n

    return jnp.mean(per_task)                  # == sum_t loss_t * (1 / num_tasks)

# TODO(synk): cfg/device plumbing and the `criterion != 'BCE'` raise are
# host-side control flow with no kernel content; only the BCE path is ported.


def _numpy_reference(pred, target, pos_weight, batch_weight):
    """Float64 reference matching torch.nn.functional.binary_cross_entropy_with_logits."""
    x = np.asarray(pred, np.float64)           # (T, N)
    y = np.asarray(target, np.float64).T       # (T, N)
    pw_cfg = np.asarray(pos_weight, np.float64)
    T, N = x.shape
    losses = []
    for t in range(T):
        xt, yt = x[t], y[t]
        if batch_weight:
            s = yt.sum()
            if s == 0:
                losses.append(0.0)
                continue
            pw = (N - s) / s
        else:
            pw = pw_cfg[t]
        sp = np.maximum(-xt, 0.0) + np.log1p(np.exp(-np.abs(xt)))   # softplus(-x)
        l = (1.0 - yt) * xt + (1.0 + (pw - 1.0) * yt) * sp
        losses.append(l.mean())
    return float(np.mean(losses))


if __name__ == "__main__":
    key = jax.random.PRNGKey(0)
    k1, k2 = jax.random.split(key)

    T = 13           # num_tasks = len(cfg.num_classes), each entry == 1
    N = 200          # batch size (deliberately not a multiple of 128 -> tail mask)

    pred = 2.0 * jax.random.normal(k1, (T, N), dtype=jnp.float32)        # logits
    target = (jax.random.uniform(k2, (N, T)) < 0.4).astype(jnp.float32)  # labels
    pos_weight = jnp.linspace(0.5, 2.0, T).astype(jnp.float32)           # cfg.pos_weight

    # block_n=128 -> 2 grid steps, exercising the resident-accumulator path.
    loss_fixed = jax.block_until_ready(
        oa_loss(pred, target, pos_weight, batch_weight=False, block_n=128))
    loss_batch = jax.block_until_ready(
        oa_loss(pred, target, pos_weight, batch_weight=True, block_n=128))

    ref_fixed = _numpy_reference(pred, target, pos_weight, batch_weight=False)
    ref_batch = _numpy_reference(pred, target, pos_weight, batch_weight=True)

    np.testing.assert_allclose(float(loss_fixed), ref_fixed, rtol=1e-5, atol=1e-6)
    np.testing.assert_allclose(float(loss_batch), ref_batch, rtol=1e-5, atol=1e-6)

    print("KERNEL_OK")
</pallas_src>

<mosaic_0001>
module attributes {stable_mosaic.version = 11 : i64} {
  func.func @_oa_sums_kernel(%arg0: i32, %arg1: memref<13x128xf32, #tpu.memory_space<vmem>>, %arg2: memref<13x128xf32, #tpu.memory_space<vmem>>, %arg3: memref<13x128xf32, #tpu.memory_space<vmem>>, %arg4: memref<13x128xf32, #tpu.memory_space<vmem>>, %arg5: memref<13x128xf32, #tpu.memory_space<vmem>>) attributes {dimension_semantics = [#tpu.dimension_semantics<arbitrary>], iteration_bounds = array<i64: 2>, scalar_prefetch = 0 : i64, scratch_operands = 0 : i64, tpu.core_type = #tpu.core_type<tc>, window_params = [{transform_indices = @transform_0, window_bounds = array<i64: 13, 128>}, {transform_indices = @transform_1, window_bounds = array<i64: 13, 128>}, {pipeline_mode = #tpu.pipeline_mode<synchronous>, transform_indices = @transform_2, window_bounds = array<i64: 13, 128>}, {pipeline_mode = #tpu.pipeline_mode<synchronous>, transform_indices = @transform_3, window_bounds = array<i64: 13, 128>}, {pipeline_mode = #tpu.pipeline_mode<synchronous>, transform_indices = @transform_4, window_bounds = array<i64: 13, 128>}]} {
    %c0_i32 = arith.constant 0 : i32
    %0 = arith.cmpi eq, %arg0, %c0_i32 : i32
    %1 = arith.extui %0 : i1 to i32
    %c0_i32_0 = arith.constant 0 : i32
    %2 = arith.cmpi ne, %1, %c0_i32_0 : i32
    scf.if %2 {
      %cst_23 = arith.constant 0.000000e+00 : f32
      %50 = vector.broadcast %cst_23 : f32 to vector<13x128xf32>
      %c0_24 = arith.constant 0 : index
      %c0_25 = arith.constant 0 : index
      %51 = vector.load %arg3[%c0_24, %c0_25] : memref<13x128xf32, #tpu.memory_space<vmem>>, vector<13x128xf32>
      tpu.vector_store %arg3[%c0_24, %c0_25], %50 {strides = array<i32>} : memref<13x128xf32, #tpu.memory_space<vmem>>, vector<13x128xf32>,
      %cst_26 = arith.constant 0.000000e+00 : f32
      %52 = vector.broadcast %cst_26 : f32 to vector<13x128xf32>
      %c0_27 = arith.constant 0 : index
      %c0_28 = arith.constant 0 : index
      %53 = vector.load %arg4[%c0_27, %c0_28] : memref<13x128xf32, #tpu.memory_space<vmem>>, vector<13x128xf32>
      tpu.vector_store %arg4[%c0_27, %c0_28], %52 {strides = array<i32>} : memref<13x128xf32, #tpu.memory_space<vmem>>, vector<13x128xf32>,
      %cst_29 = arith.constant 0.000000e+00 : f32
      %54 = vector.broadcast %cst_29 : f32 to vector<13x128xf32>
      %c0_30 = arith.constant 0 : index
      %c0_31 = arith.constant 0 : index
      %55 = vector.load %arg5[%c0_30, %c0_31] : memref<13x128xf32, #tpu.memory_space<vmem>>, vector<13x128xf32>
      tpu.vector_store %arg5[%c0_30, %c0_31], %54 {strides = array<i32>} : memref<13x128xf32, #tpu.memory_space<vmem>>, vector<13x128xf32>,
    } else {
    }
    %c0 = arith.constant 0 : index
    %c0_1 = arith.constant 0 : index
    %3 = vector.load %arg1[%c0, %c0_1] : memref<13x128xf32, #tpu.memory_space<vmem>>, vector<13x128xf32>
    %c0_2 = arith.constant 0 : index
    %c0_3 = arith.constant 0 : index
    %4 = vector.load %arg2[%c0_2, %c0_3] : memref<13x128xf32, #tpu.memory_space<vmem>>, vector<13x128xf32>
    %5 = tpu.iota {dimensions = array<i32: 1>} : vector<13x128xi32>
    %c128_i32 = arith.constant 128 : i32
    %6 = arith.muli %arg0, %c128_i32 : i32
    %7 = vector.broadcast %6 : i32 to vector<13x128xi32>
    %8 = arith.addi %5, %7 : vector<13x128xi32>
    %c200_i32 = arith.constant 200 : i32
    %9 = vector.broadcast %c200_i32 : i32 to vector<13x128xi32>
    %10 = arith.cmpi slt, %8, %9 : vector<13x128xi32>
    %11 = arith.extui %10 : vector<13x128xi1> to vector<13x128xi32>
    %12 = arith.sitofp %11 : vector<13x128xi32> to vector<13x128xf32>
    %13 = arith.mulf %4, %12 : vector<13x128xf32>
    %cst = arith.constant 0.000000e+00 : f32
    %14 = vector.broadcast %cst : f32 to vector<13x128xf32>
    %15 = arith.subf %14, %3 : vector<13x128xf32>
    %cst_4 = arith.constant 0.000000e+00 : f32
    %16 = vector.broadcast %cst_4 : f32 to vector<13x128xf32>
    %17 = arith.maximumf %15, %16 : vector<13x128xf32>
    %18 = math.absf %3 : vector<13x128xf32>
    %cst_5 = arith.constant 0.000000e+00 : f32
    %19 = vector.broadcast %cst_5 : f32 to vector<13x128xf32>
    %20 = arith.subf %19, %18 : vector<13x128xf32>
    %21 = math.exp %20 : vector<13x128xf32>
    %cst_6 = arith.constant 1.000000e+00 : f32
    %22 = vector.broadcast %cst_6 : f32 to vector<13x128xf32>
    %23 = arith.addf %22, %21 : vector<13x128xf32>
    %24 = math.log %23 : vector<13x128xf32>
    %25 = arith.addf %17, %24 : vector<13x128xf32>
    %cst_7 = arith.constant 1.000000e+00 : f32
    %26 = vector.broadcast %cst_7 : f32 to vector<13x128xf32>
    %27 = arith.subf %26, %13 : vector<13x128xf32>
    %28 = arith.mulf %27, %3 : vector<13x128xf32>
    %29 = arith.addf %28, %25 : vector<13x128xf32>
    %30 = arith.mulf %29, %12 : vector<13x128xf32>
    %31 = arith.mulf %13, %25 : vector<13x128xf32>
    %c0_8 = arith.constant 0 : index
    %c0_9 = arith.constant 0 : index
    %32 = vector.load %arg3[%c0_8, %c0_9] : memref<13x128xf32, #tpu.memory_space<vmem>>, vector<13x128xf32>
    %cst_10 = arith.constant dense<0.000000e+00> : vector<13xf32>
    %33 = vector.multi_reduction <add>, %30, %cst_10 [1] : vector<13x128xf32> to vector<13xf32>
    %34 = vector.shape_cast %33 : vector<13xf32> to vector<13x1xf32>
    %35 = vector.broadcast %34 : vector<13x1xf32> to vector<13x128xf32>
    %36 = arith.addf %32, %35 : vector<13x128xf32>
    %c0_11 = arith.constant 0 : index
    %c0_12 = arith.constant 0 : index
    %37 = vector.load %arg3[%c0_11, %c0_12] : memref<13x128xf32, #tpu.memory_space<vmem>>, vector<13x128xf32>
    tpu.vector_store %arg3[%c0_11, %c0_12], %36 {strides = array<i32>} : memref<13x128xf32, #tpu.memory_space<vmem>>, vector<13x128xf32>,
    %c0_13 = arith.constant 0 : index
    %c0_14 = arith.constant 0 : index
    %38 = vector.load %arg4[%c0_13, %c0_14] : memref<13x128xf32, #tpu.memory_space<vmem>>, vector<13x128xf32>
    %cst_15 = arith.constant dense<0.000000e+00> : vector<13xf32>
    %39 = vector.multi_reduction <add>, %31, %cst_15 [1] : vector<13x128xf32> to vector<13xf32>
    %40 = vector.shape_cast %39 : vector<13xf32> to vector<13x1xf32>
    %41 = vector.broadcast %40 : vector<13x1xf32> to vector<13x128xf32>
    %42 = arith.addf %38, %41 : vector<13x128xf32>
    %c0_16 = arith.constant 0 : index
    %c0_17 = arith.constant 0 : index
    %43 = vector.load %arg4[%c0_16, %c0_17] : memref<13x128xf32, #tpu.memory_space<vmem>>, vector<13x128xf32>
    tpu.vector_store %arg4[%c0_16, %c0_17], %42 {strides = array<i32>} : memref<13x128xf32, #tpu.memory_space<vmem>>, vector<13x128xf32>,
    %c0_18 = arith.constant 0 : index
    %c0_19 = arith.constant 0 : index
    %44 = vector.load %arg5[%c0_18, %c0_19] : memref<13x128xf32, #tpu.memory_space<vmem>>, vector<13x128xf32>
    %cst_20 = arith.constant dense<0.000000e+00> : vector<13xf32>
    %45 = vector.multi_reduction <add>, %13, %cst_20 [1] : vector<13x128xf32> to vector<13xf32>
    %46 = vector.shape_cast %45 : vector<13xf32> to vector<13x1xf32>
    %47 = vector.broadcast %46 : vector<13x1xf32> to vector<13x128xf32>
    %48 = arith.addf %44, %47 : vector<13x128xf32>
    %c0_21 = arith.constant 0 : index
    %c0_22 = arith.constant 0 : index
    %49 = vector.load %arg5[%c0_21, %c0_22] : memref<13x128xf32, #tpu.memory_space<vmem>>, vector<13x128xf32>
    tpu.vector_store %arg5[%c0_21, %c0_22], %48 {strides = array<i32>} : memref<13x128xf32, #tpu.memory_space<vmem>>, vector<13x128xf32>,
    return
  }
  func.func @transform_0(%arg0: i32) -> (i32, i32) {
    %c0_i32 = arith.constant 0 : i32
    %c0_i32_0 = arith.constant 0 : i32
    return %c0_i32, %arg0 : i32, i32
  }
  func.func @transform_1(%arg0: i32) -> (i32, i32) {
    %c0_i32 = arith.constant 0 : i32
    %c0_i32_0 = arith.constant 0 : i32
    return %c0_i32, %arg0 : i32, i32
  }
  func.func @transform_2(%arg0: i32) -> (i32, i32) {
    %c0_i32 = arith.constant 0 : i32
    %c0_i32_0 = arith.constant 0 : i32
    %c0_i32_1 = arith.constant 0 : i32
    return %c0_i32, %c0_i32_0 : i32, i32
  }
  func.func @transform_3(%arg0: i32) -> (i32, i32) {
    %c0_i32 = arith.constant 0 : i32
    %c0_i32_0 = arith.constant 0 : i32
    %c0_i32_1 = arith.constant 0 : i32
    return %c0_i32, %c0_i32_0 : i32, i32
  }
  func.func @transform_4(%arg0: i32) -> (i32, i32) {
    %c0_i32 = arith.constant 0 : i32
    %c0_i32_0 = arith.constant 0 : i32
    %c0_i32_1 = arith.constant 0 : i32
    return %c0_i32, %c0_i32_0 : i32, i32
  }
}

</mosaic_0001>

<bundles_post_ra>
// kernel: tpu_custom_call.1
= control target key start
LH: loop header
LB: loop body
LE: loop exit
PB: predicated region body
PF: predicated region fallthrough
CT: control target
= control target key end

     0   :  { %10 = vsyncpa [#allocation3], 0  ;;  %s1035_s0 = inlined_call_operand.hbm [shape: f32[13,256], index: 0, kind: input, shape index: {}]   ;;  %s1036_s1 = inlined_call_operand.hbm [shape: f32[13,256], index: 1, kind: input, shape index: {}]   ;;  %s1037_s2 = inlined_call_operand.hbm [shape: f32[13,128], index: 2, kind: output, shape index: {0}]   ;;  %s1038_s3 = inlined_call_operand.hbm [shape: f32[13,128], index: 3, kind: output, shape index: {1}]   ;;  %s1039_s4 = inlined_call_operand.hbm [shape: f32[13,128], index: 4, kind: output, shape index: {2}]  }
   0x1   :  { %12 = vsyncpa [#allocation3 + $0x1], 0 }
   0x2   :  { %13 = vsyncpa [#allocation6], 0 }
   0x3   :  { %15 = vsyncpa [#allocation6 + $0x1], 0 }
   0x4   :  { %16 = vsyncpa [#allocation4], 0 }
   0x5   :  { %17 = vsyncpa [#allocation9], 0  ;;  %s779_s15 = smov 0   ;;  %s781_s16 = smov 0  }
   0x6   :  { %s783_s17 = smov 0   ;;  %s785_s18 = smov 0  }
   0x7 LB: > { %s798_s19 = sadd.s32 4294967295, %s740_s18   ;;  %s801_s20 = sadd.s32 1, %s740_s18   ;;  %s740_s18 = sphi %s785_s18, %s1048_s18   ;;  %s736_s17 = sphi %s783_s17, %s1047_s17   ;;  %s732_s16 = sphi %s781_s16, %s1046_s16   ;;  %s728_s15 = sphi %s779_s15, %s1045_s15  }
   0x8   : > { %s27_s21 = ssub.s32 %s740_s18, %s801_s20  ;;  %s30_s22 = sadd.s32 1, %s736_s17 }
   0x9   : > { %p28_p0 = scmp.eq.s32.totalorder %s27_s21, 0  ;;  %p37_p1 = scmp.ne.s32.totalorder %s736_s17, %s732_s16 }
   0xa   : > { %p38_p2 = scmp.eq.s32.totalorder %s740_s18, 0  ;;  %p43_p3 = scmp.ne.s32.totalorder %s732_s16, %s728_s15 }
   0xb   : > { %s811_s23 = scalar_select %p28_p0, %s736_s17, %s30_s22  }
   0xc   : > { %p39_p4 = por %p38_p2, %p37_p1  ;;  %p44_p5 = scmp.eq.s32.totalorder %s798_s19, 0 }
   0xd   : > { %p499_p6 = scmp.lt.s32.totalorder %s740_s18, 2  ;;  %s820_s25 = sand.u32 1, %s736_s17  }
   0xe   : > { %p815_p7 = por %p44_p5, %p43_p3  ;;  %s458_s26 = sshll.u32 %s820_s25, 4 }
   0xf   : > { %s459_s27 = sshll.u32 %s740_s18, 7  ;;  %s160_s5 = scalar_lea.vmem [#allocation2], %s458_s26 }
  0x10   : > { %s1041_s24 = scalar_select %p815_p7, 1, 0 }
  0x11   : > { %s829_s30 = scalar_lea.hbm %s1035_s0, %s459_s27  ;;  %s166_s6 = sshll.u32 %s160_s5, 4  ;;  %s833_s6 = int_to_ptr.vmem [resolvable:$true] %s166_s6 }
  0x12   : > { %p835_p8 = pnand %p499_p6, %p39_p4  ;;  %s157_s8 = scalar_lea.sflag [#allocation3], %s820_s25 }
  0x13   : > { %s556_s9 = scalar_lea.hbm %s829_s30, 256  ;;  %s561_s12 = scalar_lea.hbm %s1035_s0, 512 }
  0x14   : > { %p557_p9 = scmp.ne.s32.totalorder %s829_s30, %s556_s9  ;;  %p558_p10 = pneg %p835_p8 }
  0x15   : > { %p562_p13 = scmp.lt.u32.totalorder %s829_s30, %s1035_s0  ;;  %p563_p0 = scmp.lt.u32.totalorder %s561_s12, %s556_s9 }
  0x16   : > { %p559_p11 = pnand %p558_p10, %p557_p9  ;;  %p565_p2 = scmp.lt.u32.totalorder %s556_s9, %s829_s30 }
  0x17   : > { %p564_p1 = por %p563_p0, %p562_p13 }
  0x18   : > { %p560_p12 = pneg %p559_p11 }
  0x19   : > { %p566_p3 = por %p565_p2, %p564_p1 }
  0x1b   : > { %p567_p4 = pnand %p566_p3, %p560_p12 }
  0x1d   : > { %570 = shalt.err (!%p567_p4)
}
  0x1e   : > { %s571_s15 = scalar_lea.vmem %s833_s6, 256  ;;  %s742_s21 = smov [#allocation2]  }
  0x1f   : > { %p572_p5 = scmp.ne.s32.totalorder %s833_s6, %s571_s15  ;;  %s576_s22 = sshll.u32 %s742_s21, 4  ;;  %s577_s22 = int_to_ptr.vmem [resolvable:$false] %s576_s22 }
  0x20   : > { %s578_s28 = scalar_lea.vmem %s577_s22, 512  ;;  %p579_p11 = scmp.lt.s32.totalorder %s833_s6, %s577_s22 }
  0x21   : > { %p574_p6 = pnand %p572_p5, %p558_p10  ;;  %p580_p13 = scmp.lt.s32.totalorder %s578_s28, %s571_s15 }
  0x23   : > { %p575_p9 = pneg %p574_p6  ;;  %p581_p0 = por %p580_p13, %p579_p11 }
  0x25   : > { %p582_p1 = pnand %p581_p0, %p575_p9 }
  0x27   : > { %585 = shalt.err (!%p582_p1)
}
  0x28   : > { %s743_s29 = smov 256   ;;  %s744_s5 = smov 128  }
  0x29   : > { %s745_s9 = smov 8   ;;  %p462_p12 = scmp.ge.s32.totalorder %s740_s18, 1 }
  0x2a   : > { %495 = dma.hbm_to_vmem [thread:$0]  (!%p835_p8), %s829_s30, 256, %s833_s6, %s157_s8, %s743_s29, %s744_s5, %s745_s9  }
  0x2b   : > { %p194_p2 = scmp.lt.s32.totalorder %s740_s18, 3  ;;  %s881_s13 = scalar_lea.hbm %s1036_s1, %s459_s27 }
  0x2c   : > { %s180_s14 = scalar_lea.vmem [#allocation5], %s458_s26  ;;  %s177_s30 = scalar_lea.sflag [#allocation6], %s820_s25 }
  0x2d   : > { %p872_p3 = pnand %p462_p12, %p194_p2  ;;  %s186_s15 = sshll.u32 %s180_s14, 4  ;;  %s885_s15 = int_to_ptr.vmem [resolvable:$true] %s186_s15 }
  0x2e   : > { %s586_s6 = scalar_lea.hbm %s881_s13, 256  ;;  %s591_s27 = scalar_lea.hbm %s1036_s1, 512 }
  0x2f   : > { %p587_p4 = scmp.ne.s32.totalorder %s881_s13, %s586_s6  ;;  %p592_p9 = scmp.lt.u32.totalorder %s881_s13, %s1036_s1 }
  0x30   : > { %p593_p11 = scmp.lt.u32.totalorder %s591_s27, %s586_s6  ;;  %p595_p0 = scmp.lt.u32.totalorder %s586_s6, %s881_s13 }
  0x31   : > { %p589_p5 = pnand %p587_p4, %p558_p10 }
  0x32   : > { %p594_p13 = por %p593_p11, %p592_p9 }
  0x33   : > { %p590_p6 = pneg %p589_p5 }
  0x34   : > { %p596_p1 = por %p595_p0, %p594_p13 }
  0x36   : > { %p597_p12 = pnand %p596_p1, %p590_p6 }
  0x38   : > { %600 = shalt.err (!%p597_p12)
}
  0x39   : > { %s601_s26 = scalar_lea.vmem %s885_s15, 256  ;;  %s746_s28 = smov [#allocation5]  }
  0x3a   : > { %p602_p2 = scmp.ne.s32.totalorder %s885_s15, %s601_s26  ;;  %s606_s11 = sshll.u32 %s746_s28, 4  ;;  %s607_s11 = int_to_ptr.vmem [resolvable:$false] %s606_s11 }
  0x3b   : > { %s608_s12 = scalar_lea.vmem %s607_s11, 512  ;;  %p609_p7 = scmp.lt.s32.totalorder %s885_s15, %s607_s11 }
  0x3c   : > { %p604_p4 = pnand %p602_p2, %p558_p10  ;;  %p610_p9 = scmp.lt.s32.totalorder %s608_s12, %s601_s26 }
  0x3e   : > { %p605_p5 = pneg %p604_p4  ;;  %p611_p11 = por %p610_p9, %p609_p7 }
  0x40   : > { %p612_p13 = pnand %p611_p11, %p605_p5 }
  0x42   : > { %615 = shalt.err (!%p612_p13)
}
  0x43   : > { %498 = dma.hbm_to_vmem [thread:$0]  (!%p835_p8), %s881_s13, 256, %s885_s15, %s177_s30, %s743_s29, %s744_s5, %s745_s9  }
  0x44   : > { %198 = sbr.rel (%p872_p3) target bundleno = 333 (0x14d), region = 28  ;;  %s200_s14 = sand.u32 (!%p872_p3), 1, %s732_s16  }
  0x45   : > { %s463_s6 = sshll.u32 (!%p872_p3), %s200_s14, 4  ;;  %s201_s18 = scalar_lea.sflag (!%p872_p3), [#allocation3], %s200_s14 }
  0x46   : > { %s204_s8 = scalar_lea.vmem (!%p872_p3), [#allocation2], %s463_s6  ;;  %p1044_p7 = scmp.ne.s32.totalorder (!%p872_p3), %s1041_s24, 0 }
  0x4b   : > { %711 = dma.done.wait (%p1044_p7), %s201_s18, 256  }
  0x4c   : > { %713 = vsyncadd (%p1044_p7), %s201_s18, 4294967040  ;;  %s210_s7 = scalar_lea.sflag [#allocation6], %s200_s14  ;;  %s923_s25 = scalar_lea.vmem [#allocation5], %s463_s6 }
  0x4d   : > { %715 = dma.done.wait (%p1044_p7), %s210_s7, 256  }
  0x4e   : > { %717 = vsyncadd (%p1044_p7), %s210_s7, 4294967040  ;;  %p465_p8 = scmp.ne.s32.totalorder %s798_s19, 0 }
  0x4f   : > { %v747_v0 = vmov (!%p465_p8), 0.0  }
  0x50   : > { %241 = sbr.rel (%p465_p8) target bundleno = 87 (0x57), region = 40  ;;  %242 = vst [vmem:[#allocation7] sm:$0xff] (!%p465_p8), %v747_v0  ;;  %243 = vst [vmem:[#allocation7 + $0x8] sm:$0x1f] (!%p465_p8), %v747_v0 }
  0x51   : > { %244 = vst [vmem:[#allocation8] sm:$0xff] (!%p465_p8), %v747_v0  ;;  %245 = vst [vmem:[#allocation8 + $0x8] sm:$0x1f] (!%p465_p8), %v747_v0 }
  0x52   : > { %246 = vst [vmem:[#allocation10] sm:$0xff] (!%p465_p8), %v747_v0  ;;  %247 = vst [vmem:[#allocation10 + $0x8] sm:$0x1f] (!%p465_p8), %v747_v0 }
  0x57 PF: > { %v248_v1 = vld [vmem:[%s204_s8] sm:$0xff]  ;;  %v249_v2 = vld [vmem:[%s204_s8 + $0x8] sm:$0x1f]  ;;  %v252_v7 = vlaneseq  ;;  %s466_s24 = sshll.u32 %s798_s19, 7  ;;  %v748_v18 = vmov 0.0   ;;  %vm296_vm1 = vcmask 1044480  }
  0x58   : > { %v266_v3 = vand.u32 2147483647, %v248_v1  ;;  %v267_v4 = vand.u32 2147483647, %v249_v2  ;;  %v255_v11 = vstv %s466_s24  ;;  %v250_v17 = vld [vmem:[%s923_s25] sm:$0xff]  ;;  %v262_v23 = vsub.f32 0.0, %v248_v1 }
  0x59   : > { %v253_v10 = vand.u32 127, %v252_v7  ;;  %v251_v20 = vld [vmem:[%s923_s25 + $0x8] sm:$0x1f]  ;;  %v263_v24 = vsub.f32 0.0, %v249_v2  ;;  %v304_v46 = vld [vmem:[#allocation8] sm:$0xff]  ;;  %v292_v48 = vld [vmem:[#allocation7] sm:$0xff] }
  0x5a   : > { %v268_v5 = vsub.f32 0.0, %v266_v3  ;;  %v269_v6 = vsub.f32 0.0, %v267_v4  ;;  %v264_v27 = vmax.f32 %v262_v23, 0.0  ;;  %v305_v51 = vld [vmem:[#allocation8 + $0x8] sm:$0x1f]  ;;  %s749_s29 = smov [#allocation8]  }
  0x5b   : > { %v256_v12 = vadd.s32 %v255_v11, %v253_v10  ;;  %v265_v29 = vmax.f32 %v263_v24, 0.0  ;;  %s345_s5 = sshll.u32 %s749_s29, 4  ;;  %p500_p10 = scmp.eq.s32.totalorder %s798_s19, 1  ;;  %v293_v54 = vld [vmem:[#allocation7 + $0x8] sm:$0x1f]  ;;  %v315_v57 = vld [vmem:[#allocation10] sm:$0xff]  ;;  %s934_s5 = int_to_ptr.vmem [resolvable:$true] %s345_s5 }
  0x5c   : > { %v270_v8 = vmul.f32 1.442695, %v268_v5  ;;  %v272_v9 = vmul.f32 1.442695, %v269_v6  ;;  %s750_s9 = smov [#allocation7]   ;;  %s751_s13 = smov [#allocation10]  }
  0x5d   : > { %vm257_vm0 = vcmp.lt.s32.totalorder %v256_v12, 200  ;;  %s332_s10 = sshll.u32 %s750_s9, 4  ;;  %s938_s15 = sshll.u32 %s751_s13, 4  ;;  %v316_v60 = vld [vmem:[#allocation10 + $0x8] sm:$0x1f]  ;;  %s936_s10 = int_to_ptr.vmem [resolvable:$true] %s332_s10  ;;  %s359_s15 = int_to_ptr.vmem [resolvable:$true] %s938_s15 }
  0x5e   : > { %548 = vpow2.f32 %v270_v8  ;;  %v467_v19 = vsel %vm257_vm0, 1.0, %v748_v18  ;;  %s616_s30 = scalar_lea.vmem %s934_s5, 256  ;;  %p623_p1 = scmp.lt.s32.totalorder %s934_s5, %s934_s5 }
  0x5f   : > { %550 = vpow2.f32 %v272_v9  ;;  %v260_v21 = vmul.f32 %v467_v19, %v250_v17  ;;  %v261_v22 = vmul.f32 %v467_v19, %v251_v20  ;;  %p617_p3 = scmp.ne.s32.totalorder %s934_s5, %s616_s30  ;;  %p624_p12 = scmp.lt.s32.totalorder %s616_s30, %s616_s30 }
  0x61   : > { %v282_v25 = vsub.f32 1.0, %v260_v21  ;;  %v283_v26 = vsub.f32 1.0, %v261_v22  ;;  %v319_v45 = vsel %vm296_vm1, %v261_v22, 0.0  ;;  %p618_p6 = pnand %p617_p3, %p500_p10  ;;  %p625_p2 = por %p624_p12, %p623_p1 }
  0x63   : > { %v284_v32 = vmul.f32 %v282_v25, %v248_v1  ;;  %v285_v34 = vmul.f32 %v283_v26, %v249_v2  ;;  %p619_p0 = pneg %p618_p6 }
  0x65   : > { %p626_p4 = pnand %p625_p2, %p619_p0 }
  0x68   : > { %v549_v13 = vpop.eup %548 }
  0x69   : > { %v551_v14 = vpop.eup %550  ;;  %v274_v15 = vadd.f32 1.0, %v549_v13 }
  0x6a   : > { %v275_v16 = vadd.f32 1.0, %v551_v14 }
  0x6b   : > { %552 = vlog2.f32 %v274_v15 }
  0x6c   : > { %554 = vlog2.f32 %v275_v16 }
  0x75   : > { %v553_v28 = vpop.eup %552 }
  0x76   : > { %v555_v30 = vpop.eup %554  ;;  %v277_v31 = vmul.f32 0.6931472, %v553_v28 }
  0x77   : > { %v279_v33 = vmul.f32 0.6931472, %v555_v30 }
  0x78   : > { %v280_v35 = vadd.f32 %v277_v31, %v264_v27 }
  0x79   : > { %v281_v36 = vadd.f32 %v279_v33, %v265_v29 }
  0x7a   : > { %v290_v37 = vmul.f32 %v280_v35, %v260_v21  ;;  %v286_v38 = vadd.f32 %v284_v32, %v280_v35 }
  0x7b   : > { %v291_v39 = vmul.f32 %v281_v36, %v261_v22  ;;  %v287_v40 = vadd.f32 %v285_v34, %v281_v36 }
  0x7c   : > { %306 = vadd.xlane.f32.xlu0 %v290_v37  ;;  %v288_v41 = vmul.f32 %v467_v19, %v286_v38 }
  0x7d   : > { %v308_v42 = vsel %vm296_vm1, %v291_v39, 0.0  ;;  %v289_v43 = vmul.f32 %v467_v19, %v287_v40 }
  0x7e   : > { %294 = vadd.xlane.f32.xlu1 %v288_v41 }
  0x7f   : > { %v297_v44 = vsel %vm296_vm1, %v289_v43, 0.0 }
  0x80   : > { %309 = vadd.xlane.f32.xlu0 %v308_v42 }
  0x82   : > { %298 = vadd.xlane.f32.xlu1 %v297_v44 }
  0x84   : > { %317 = vadd.xlane.f32.xlu0 %v260_v21 }
  0x86   : > { %320 = vadd.xlane.f32.xlu1 %v319_v45 }
 0x109   : > { %v307_v47 = vpop.xlane.xlu0 %306 }
 0x10a   : > { %v311_v49 = vadd.f32 %v307_v47, %v304_v46 }
 0x10b   : > { %v295_v50 = vpop.xlane.xlu1 %294 }
 0x10c   : > { %313 = vst [vmem:[#allocation8] sm:$0xff] %v311_v49  ;;  %v300_v52 = vadd.f32 %v295_v50, %v292_v48 }
 0x10d   : > { %v310_v53 = vpop.xlane.xlu0 %309 }
 0x10e   : > { %302 = vst [vmem:[#allocation7] sm:$0xff] %v300_v52  ;;  %v312_v55 = vadd.f32 %v310_v53, %v305_v51 }
 0x10f   : > { %v299_v56 = vpop.xlane.xlu1 %298 }
 0x110   : > { %314 = vst [vmem:[#allocation8 + $0x8] sm:$0x1f] %v312_v55  ;;  %v301_v58 = vadd.f32 %v299_v56, %v293_v54 }
 0x111   : > { %v318_v59 = vpop.xlane.xlu0 %317 }
 0x112   : > { %629 = shalt.err (!%p626_p4)
}
 0x113   : > { %s630_s22 = scalar_lea.hbm %s1038_s3, 256 }
 0x114   : > { %p631_p5 = scmp.ne.s32.totalorder %s1038_s3, %s630_s22  ;;  %p636_p13 = scmp.lt.u32.totalorder %s630_s22, %s1038_s3 }
 0x116   : > { %p632_p9 = pnand %p631_p5, %p500_p10 }
 0x118   : > { %p633_p11 = pneg %p632_p9 }
 0x11a   : > { %p638_p7 = pnand %p636_p13, %p633_p11 }
 0x11c   : > { %641 = shalt.err (!%p638_p7)
}
 0x11d   : > { %s752_s14 = smov 128   ;;  %s753_s6 = smov 8   ;;  %303 = vst [vmem:[#allocation7 + $0x8] sm:$0x1f] %v301_v58  ;;  %v322_v61 = vadd.f32 %v318_v59, %v315_v57  ;;  %v321_v62 = vpop.xlane.xlu1 %320 }
 0x11e   : > { %483 = dma.vmem_to_hbm [thread:$0]  (%p500_p10), %s934_s5, 256, %s1038_s3, [#allocation9], %s752_s14, %s752_s14, %s753_s6  }
 0x11f   : > { %s642_s7 = scalar_lea.vmem %s936_s10, 256  ;;  %p649_p0 = scmp.lt.s32.totalorder %s936_s10, %s936_s10 }
 0x120   : > { %p643_p8 = scmp.ne.s32.totalorder %s936_s10, %s642_s7  ;;  %p650_p1 = scmp.lt.s32.totalorder %s642_s7, %s642_s7 }
 0x122   : > { %p644_p3 = pnand %p643_p8, %p500_p10  ;;  %p651_p12 = por %p650_p1, %p649_p0 }
 0x124   : > { %p645_p6 = pneg %p644_p3 }
 0x126   : > { %p652_p2 = pnand %p651_p12, %p645_p6 }
 0x128   : > { %655 = shalt.err (!%p652_p2)
}
 0x129   : > { %s656_s29 = scalar_lea.hbm %s1037_s2, 256 }
 0x12a   : > { %p657_p4 = scmp.ne.s32.totalorder %s1037_s2, %s656_s29  ;;  %p662_p11 = scmp.lt.u32.totalorder %s656_s29, %s1037_s2 }
 0x12c   : > { %p658_p5 = pnand %p657_p4, %p500_p10 }
 0x12e   : > { %p659_p9 = pneg %p658_p5 }
 0x130   : > { %p664_p13 = pnand %p662_p11, %p659_p9 }
 0x132   : > { %667 = shalt.err (!%p664_p13)
}
 0x133   : > { %481 = dma.vmem_to_hbm [thread:$0]  (%p500_p10), %s936_s10, 256, %s1037_s2, [#allocation4], %s752_s14, %s752_s14, %s753_s6   ;;  %324 = vst [vmem:[#allocation10] sm:$0xff] %v322_v61  ;;  %v323_v63 = vadd.f32 %v321_v62, %v316_v60 }
 0x134   : > { %s668_s22 = scalar_lea.vmem %s359_s15, 256  ;;  %p675_p6 = scmp.lt.s32.totalorder %s359_s15, %s359_s15 }
 0x135   : > { %325 = vst [vmem:[#allocation10 + $0x8] sm:$0x1f] %v323_v63  ;;  %p669_p7 = scmp.ne.s32.totalorder %s359_s15, %s668_s22  ;;  %p676_p0 = scmp.lt.s32.totalorder %s668_s22, %s668_s22 }
 0x137   : > { %p670_p8 = pnand %p669_p7, %p500_p10  ;;  %p677_p1 = por %p676_p0, %p675_p6 }
 0x139   : > { %p671_p3 = pneg %p670_p8 }
 0x13b   : > { %p678_p12 = pnand %p677_p1, %p671_p3 }
 0x13d   : > { %681 = shalt.err (!%p678_p12)
}
 0x13e   : > { %s682_s11 = scalar_lea.hbm %s1039_s4, 256 }
 0x13f   : > { %p683_p2 = scmp.ne.s32.totalorder %s1039_s4, %s682_s11  ;;  %p688_p9 = scmp.lt.u32.totalorder %s682_s11, %s1039_s4 }
 0x141   : > { %p684_p4 = pnand %p683_p2, %p500_p10 }
 0x143   : > { %p685_p5 = pneg %p684_p4 }
 0x145   : > { %p690_p11 = pnand %p688_p9, %p685_p5 }
 0x147   : > { %693 = shalt.err (!%p690_p11)
}
 0x148   : > { %485 = dma.vmem_to_hbm [thread:$0]  (%p500_p10), %s359_s15, 256, %s1039_s4, [#allocation9], %s752_s14, %s752_s14, %s753_s6  }
 0x149   : > { %719 = dma.done.wait (%p500_p10), [#allocation4], 256  }
 0x14a   : > { %721 = vsyncadd (%p500_p10), [#allocation4], 4294967040 }
 0x14b   : > { %723 = dma.done.wait (%p500_p10), [#allocation9], 512  }
 0x14c   : > { %725 = vsyncadd (%p500_p10), [#allocation9], 4294966784 }
 0x14d PF: > { %p20_p13 = scmp.ge.s32.totalorder %s801_s20, 4   ;;  %s1045_s15 = smov %s732_s16 }
 0x14e   : > { %s1046_s16 = smov %s736_s17  ;;  %s1047_s17 = smov %s811_s23 }
 0x14f   : > { %s1048_s18 = smov %s801_s20  ;;  %22 = sbr.rel (!%p20_p13) target bundleno = 7 (0x7), region = 98 }
 0x156   :  { %382 = vsyncpa [#allocation3], 1 }
 0x157   :  { %384 = vsyncpa [#allocation3 + $0x1], 1 }
 0x158   :  { %385 = vsyncpa [#allocation6], 1 }
 0x159   :  { %387 = vsyncpa [#allocation6 + $0x1], 1 }
 0x15a   :  { %388 = vsyncpa [#allocation4], 1 }
 0x15b   :  { %390 = vsyncpa [#allocation4 + $0x1], 1 }
 0x15c   :  { %391 = vsyncpa [#allocation9], 1 }

</bundles_post_ra>
